<compile_context>
chip_gen: v7x
topology: tpu7x:2x2x1
jax: 0.10.0
libtpu: 0.0.40
codegen_flags: <defaults>
</compile_context>

<pallas_src>
import functools

import jax
import jax.numpy as jnp
import numpy as np
from jax import lax
from jax.experimental import pallas as pl
from jax.experimental.pallas import tpu as pltpu


def _round_up(x, m):
    return ((x + m - 1) // m) * m


def _pair(v):
    return (v, v) if isinstance(v, int) else tuple(v)


def _vmem_limit_bytes():
    """Scoped-VMEM budget: ~100 MB on 128 MiB parts (v5e/v6e), 3/4 of physical
    on smaller parts (v7x: 64 MiB -> 48 MB)."""
    try:
        cap = int(pltpu.get_tpu_info().vmem_capacity_bytes)
    except Exception:
        return None                      # fall back to the compiler default
    if cap >= 120 * 1024 * 1024:
        return 100 * 1024 * 1024
    return (cap * 3) // 4


@functools.lru_cache(maxsize=None)
def _buffered_single_ok():
    """Probe once whether pipeline_mode=pl.Buffered(1) (single-buffered
    resident inputs) is supported by the installed jax/libtpu."""
    try:
        spec = pl.BlockSpec((8, 128), lambda i: (0, 0),
                            pipeline_mode=pl.Buffered(1))

        def _probe(x_ref, o_ref):
            o_ref[...] = x_ref[...] + 1.0

        out = pl.pallas_call(
            _probe,
            out_shape=jax.ShapeDtypeStruct((8, 128), jnp.float32),
            grid=(1,),
            in_specs=[spec],
            out_specs=pl.BlockSpec((8, 128), lambda i: (0, 0)),
        )(jnp.zeros((8, 128), jnp.float32))
        jax.block_until_ready(out)
        return True
    except Exception:
        return False


def _resident_spec(block_shape, index_map):
    """BlockSpec for grid-resident inputs (constant / slowly varying index
    map): request a single pipeline buffer so they are not double buffered."""
    if _buffered_single_ok():
        return pl.BlockSpec(block_shape, index_map,
                            pipeline_mode=pl.Buffered(1))
    return pl.BlockSpec(block_shape, index_map)


# ---------------------------------------------------------------------------
# Kernels
# ---------------------------------------------------------------------------


def _gemm_scale_bias_relu_kernel(x_ref, w_ref, s_ref, b_ref, o_ref):
    """o = relu(scale * (x @ w) + bias) for one (TM, TOC) output tile.

    x_ref: (TM, Kp)  bf16  flattened (pixel, tap*channel) patch rows.
    w_ref: (Kp, TOC) bf16  plain (unscaled) conv weights.
    s_ref: (1, TOC)  f32   folded BN scale  (gamma / sqrt(var + eps)).
    b_ref: (1, TOC)  f32   folded BN bias   (beta - mean * scale).
    o_ref: (TM, TOC)       lane-dense output tile (TOC % 128 == 0).
    """
    acc = jnp.dot(x_ref[...], w_ref[...], preferred_element_type=jnp.float32)
    o_ref[...] = jnp.maximum(acc * s_ref[...] + b_ref[...],
                             0.0).astype(o_ref.dtype)


def _implicit_conv_kernel(x_ref, w_ref, s_ref, b_ref, o_ref, acc_ref, *,
                          kh_sz, kw_sz, stride, th, owp):
    """One grid step computes the (th, owp, OCp) output tile of one image.

    x_ref:   (s*s, Hq, Wq, Cp) bf16 phase-decomposed padded image (resident).
    w_ref:   (KH, KW, Cp, OCp) bf16 plain conv weights (resident).
    s_ref:   (1, OCp) f32 folded BN scale.
    b_ref:   (1, OCp) f32 folded BN bias.
    o_ref:   (th, owp, OCp) output tile (lane dense, OCp % 128 == 0).
    acc_ref: (th*owp, OCp) f32 VMEM scratch accumulator.
    """
    s = stride
    cp = x_ref.shape[-1]
    ocp = o_ref.shape[-1]
    oh0 = pl.program_id(1) * th
    if th % 8 == 0:
        oh0 = pl.multiple_of(oh0, 8)         # aligned H-window start

    first = True
    for kh in range(kh_sz):
        rows = None
        if s == 1:
            # hoist the row-window load out of the kw loop (stride-1 case)
            rows = x_ref[0, pl.ds(oh0 + kh, th), :, :]          # (th, Wq, Cp)
        for kw in range(kw_sz):
            if s == 1:
                patch = rows[:, kw:kw + owp, :]                 # (th, owp, Cp)
            else:
                phase = (kh % s) * s + (kw % s)
                patch = x_ref[phase, pl.ds(oh0 + kh // s, th),
                              kw // s:kw // s + owp, :]
            contrib = jnp.dot(patch.reshape(th * owp, cp), w_ref[kh, kw],
                              preferred_element_type=jnp.float32)
            if first:
                acc_ref[...] = contrib       # first tap: no zero-init pass
                first = False
            else:
                acc_ref[...] += contrib
    y = jnp.maximum(acc_ref[...] * s_ref[...] + b_ref[...], 0.0)
    o_ref[...] = y.reshape(th, owp, ocp).astype(o_ref.dtype)


# ---------------------------------------------------------------------------
# Host-side wrappers
# ---------------------------------------------------------------------------

_SMALL_C_THRESHOLD = 96   # below this, pack the KH*KW taps into K host-side


def _conv_as_gemm(x, weight, scale, bias, *, stride, ph, pw, out_dtype,
                  keep_padded_channels, target_m=512, max_toc=512):
    """Conv+BN+ReLU as one flattened GEMM; KH*KW taps packed into K."""
    N, H, W, C = x.shape
    OC, _, KH, KW = weight.shape
    s = int(stride)
    OH = (H + 2 * ph - KH) // s + 1
    OW = (W + 2 * pw - KW) // s + 1
    OCp = _round_up(OC, 128)

    xb = x.astype(jnp.bfloat16)
    if KH == 1 and KW == 1 and s == 1 and ph == 0 and pw == 0:
        patches = xb                                            # (N, H, W, C)
    else:
        xpad = jnp.pad(xb, ((0, 0), (ph, ph), (pw, pw), (0, 0)))
        cols = []
        for kh in range(KH):
            for kw in range(KW):
                cols.append(xpad[:, kh:kh + (OH - 1) * s + 1:s,
                                 kw:kw + (OW - 1) * s + 1:s, :])
        patches = jnp.concatenate(cols, axis=-1)                # (N,OH,OW,K)

    K = KH * KW * C
    Kp = _round_up(K, 8) if K < 128 else _round_up(K, 128)
    M = N * OH * OW
    TM = min(target_m, _round_up(M, 8))
    Mp = _round_up(M, TM)

    xm = jnp.pad(patches.reshape(M, K), ((0, Mp - M), (0, Kp - K)))

    # plain (unscaled) weights, (OC,C,KH,KW) -> (Kp, OCp) bf16
    wm = weight.astype(jnp.float32).transpose(2, 3, 1, 0).reshape(K, OC)
    wm = jnp.pad(wm, ((0, Kp - K), (0, OCp - OC))).astype(jnp.bfloat16)
    sc = jnp.pad(scale, (0, OCp - OC)).reshape(1, OCp)
    bi = jnp.pad(bias, (0, OCp - OC)).reshape(1, OCp)

    TOC = OCp
    if OCp > max_toc:
        for cand in (512, 384, 256, 128):
            if OCp % cand == 0:
                TOC = cand
                break

    if TOC == OCp:        # grid-invariant weight tile -> single buffer
        w_spec = _resident_spec((Kp, TOC), lambda i, j: (0, j))
        s_spec = _resident_spec((1, TOC), lambda i, j: (0, j))
        b_spec = _resident_spec((1, TOC), lambda i, j: (0, j))
    else:
        w_spec = pl.BlockSpec((Kp, TOC), lambda i, j: (0, j))
        s_spec = pl.BlockSpec((1, TOC), lambda i, j: (0, j))
        b_spec = pl.BlockSpec((1, TOC), lambda i, j: (0, j))

    out = pl.pallas_call(
        _gemm_scale_bias_relu_kernel,
        out_shape=jax.ShapeDtypeStruct((Mp, OCp), out_dtype),
        grid_spec=pltpu.PrefetchScalarGridSpec(
            num_scalar_prefetch=0,
            grid=(Mp // TM, OCp // TOC),
            in_specs=[
                pl.BlockSpec((TM, Kp), lambda i, j: (i, 0)),
                w_spec, s_spec, b_spec,
            ],
            out_specs=pl.BlockSpec((TM, TOC), lambda i, j: (i, j)),
        ),
        compiler_params=pltpu.CompilerParams(
            dimension_semantics=("parallel", "parallel"),
            vmem_limit_bytes=_vmem_limit_bytes(),
        ),
    )(xm, wm, sc, bi)

    out = out[:M].reshape(N, OH, OW, OCp)
    return out if keep_padded_channels else out[..., :OC]


def _pick_row_tile(oh, owp, *, min_m=256, max_m=1024):
    """Row tile TH and padded OHp (multiple of TH): target MXU M = TH*OWp in
    [min_m, max_m] with minimal padded-row waste (prime 17/71/73 no longer
    degenerate to TH=1)."""
    if oh * owp <= max_m:
        return oh, oh
    lo = max(1, -(-min_m // owp))
    hi = max(lo, max_m // owp)
    best_th, best_waste = lo, _round_up(oh, lo) - oh
    for th in range(lo, hi + 1):
        waste = _round_up(oh, th) - oh
        if waste < best_waste or (waste == best_waste and th > best_th):
            best_th, best_waste = th, waste
    return best_th, _round_up(oh, best_th)


def _conv_implicit_gemm(x, weight, scale, bias, *, stride, ph, pw, out_dtype,
                        keep_padded_channels):
    """Implicit-GEMM conv+BN+ReLU: phase-decomposed padded image resident in
    VMEM; each tap adds one shifted (TH*OWp, Cp)x(Cp, OCp) MXU matmul into an
    f32 VMEM accumulator."""
    N, H, W, C = x.shape
    OC, _, KH, KW = weight.shape
    s = int(stride)
    OH = (H + 2 * ph - KH) // s + 1
    OW = (W + 2 * pw - KW) // s + 1
    Cp = _round_up(C, 128)
    OCp = _round_up(OC, 128)
    OWp = _round_up(OW, 8)          # tile-aligned (th,owp,Cp)->(th*owp,Cp)
    TH, OHp = _pick_row_tile(OH, OWp)

    # phase-image extents: enough rows/cols for the padded output tile grid
    Hq = max(OHp + (KH - 1) // s, -(-(H + 2 * ph) // s))
    Wq = max(OWp + (KW - 1) // s, -(-(W + 2 * pw) // s))

    xb = jnp.pad(x, ((0, 0), (ph, Hq * s - H - ph), (pw, Wq * s - W - pw),
                     (0, Cp - C))).astype(jnp.bfloat16)
    # (N, Hq*s, Wq*s, Cp) -> (N, s*s, Hq, Wq, Cp); phase p = (ih%s)*s + (iw%s)
    xph = xb.reshape(N, Hq, s, Wq, s, Cp).transpose(0, 2, 4, 1, 3, 5)
    xph = xph.reshape(N, s * s, Hq, Wq, Cp)

    w = weight.astype(jnp.float32).transpose(2, 3, 1, 0)        # (KH,KW,C,OC)
    w = jnp.pad(w, ((0, 0), (0, 0), (0, Cp - C), (0, OCp - OC)))
    w = w.astype(jnp.bfloat16)
    sc = jnp.pad(scale, (0, OCp - OC)).reshape(1, OCp)
    bi = jnp.pad(bias, (0, OCp - OC)).reshape(1, OCp)

    kernel = functools.partial(_implicit_conv_kernel, kh_sz=KH, kw_sz=KW,
                               stride=s, th=TH, owp=OWp)

    out = pl.pallas_call(
        kernel,
        out_shape=jax.ShapeDtypeStruct((N, OHp, OWp, OCp), out_dtype),
        grid_spec=pltpu.PrefetchScalarGridSpec(
            num_scalar_prefetch=0,
            grid=(N, OHp // TH),
            in_specs=[
                # whole phase-decomposed image of batch n (VMEM resident)
                _resident_spec((None, s * s, Hq, Wq, Cp),
                               lambda n, t: (n, 0, 0, 0, 0)),
                _resident_spec((KH, KW, Cp, OCp), lambda n, t: (0, 0, 0, 0)),
                _resident_spec((1, OCp), lambda n, t: (0, 0)),
                _resident_spec((1, OCp), lambda n, t: (0, 0)),
            ],
            out_specs=pl.BlockSpec((None, TH, OWp, OCp),
                                   lambda n, t: (n, t, 0, 0)),
            scratch_shapes=[pltpu.VMEM((TH * OWp, OCp), jnp.float32)],
        ),
        compiler_params=pltpu.CompilerParams(
            dimension_semantics=("parallel", "parallel"),
            vmem_limit_bytes=_vmem_limit_bytes(),
        ),
    )(xph, w, sc, bi)

    out = out[:, :OH, :OW, :]                 # drop ragged-tile spatial pad
    return out if keep_padded_channels else out[..., :OC]


def basic_conv2d_nhwc(x, weight, gamma, beta, running_mean, running_var, *,
                      stride, padding=0, eps=1e-3, out_dtype=jnp.bfloat16,
                      keep_padded_channels=False):
    """Fused Conv2d(bias=False) + BatchNorm2d(eval, eps) + ReLU.

    x:      (N, H, W, C)     NHWC activations (C may already be zero-padded
                             beyond the PyTorch channel count).
    weight: (OC, Cw, KH, KW) PyTorch OIHW conv weight, Cw <= C.
    Returns (N, OH, OW, OC), or (..., round_up(OC,128)) bf16 when
    keep_padded_channels=True (for chaining layers without re-padding).
    """
    N, H, W, C = x.shape
    OC, Cw, KH, KW = weight.shape
    if C != Cw:
        if C < Cw:
            raise ValueError(f"input has {C} channels, weight expects {Cw}")
        # activation arrives channel-padded (padded channels are exact zeros)
        weight = jnp.pad(weight, ((0, 0), (0, C - Cw), (0, 0), (0, 0)))
    ph, pw = _pair(padding)

    f32 = jnp.float32
    scale = gamma.astype(f32) / jnp.sqrt(running_var.astype(f32) + eps)
    bias = beta.astype(f32) - running_mean.astype(f32) * scale

    common = dict(stride=stride, ph=ph, pw=pw, out_dtype=out_dtype,
                  keep_padded_channels=keep_padded_channels)
    if (KH == 1 and KW == 1) or C < _SMALL_C_THRESHOLD:
        return _conv_as_gemm(x, weight, scale, bias, **common)
    return _conv_implicit_gemm(x, weight, scale, bias, **common)


def fused_branch_conv1x1_nhwc(x, branches, **kwargs):
    """Fuse parallel 1x1 BasicConv2d branches sharing one input (Block35/17/8,
    Mixed_5b): weights are concatenated along OC so one pass over the shared
    activation feeds a wide MXU N dimension, then the result is split.

    branches: list of (weight(OC_i, C, 1, 1), gamma, beta, mean, var).
    (Do not pass keep_padded_channels=True here.)
    """
    ws, gs, bs, ms, vs = zip(*branches)
    ocs = [w.shape[0] for w in ws]
    out = basic_conv2d_nhwc(
        x, jnp.concatenate(ws, axis=0), jnp.concatenate(gs),
        jnp.concatenate(bs), jnp.concatenate(ms), jnp.concatenate(vs),
        stride=1, padding=0, **kwargs)
    return jnp.split(out, list(np.cumsum(ocs)[:-1]), axis=-1)


# ---------------------------------------------------------------------------
# Reference (same math: bf16 conv weights, f32 accumulation, f32 BN epilogue)
# ---------------------------------------------------------------------------


def _reference_nhwc(x, weight, gamma, beta, running_mean, running_var, *,
                    stride, padding, eps=1e-3):
    f32 = jnp.float32
    scale = gamma.astype(f32) / jnp.sqrt(running_var.astype(f32) + eps)
    bias = beta.astype(f32) - running_mean.astype(f32) * scale
    w = weight.astype(f32).transpose(2, 3, 1, 0).astype(jnp.bfloat16)
    ph, pw = _pair(padding)
    y = lax.conv_general_dilated(
        x.astype(jnp.bfloat16), w, window_strides=(stride, stride),
        padding=((ph, ph), (pw, pw)),
        dimension_numbers=("NHWC", "HWIO", "NHWC"),
        preferred_element_type=jnp.float32)
    return jnp.maximum(y * scale[None, None, None, :]
                       + bias[None, None, None, :], 0.0)


if __name__ == "__main__":
    key = jax.random.PRNGKey(0)

    # Small, representative BasicConv2d shapes; both kernel paths exercised.
    # (name, N, H, W, C, OC, (KH, KW), stride, (ph, pw))
    configs = [
        ("1x1_s1_gemm",         2,  8,  8,  32, 16, (1, 1), 1, (0, 0)),
        ("stem_3x3_s2_packedK", 1, 17, 17,   3,  8, (3, 3), 2, (0, 0)),
        ("3x3_s1_p1_packedK",   2, 16, 16,   4,  8, (3, 3), 1, (1, 1)),
        ("1x7_s1_p03_packedK",  1, 16, 16,   8,  8, (1, 7), 1, (0, 3)),
        ("3x3_s1_p1_implicit",  2,  9,  9, 128, 32, (3, 3), 1, (1, 1)),
        ("3x3_s2_p0_implicit",  1, 17, 17, 128, 32, (3, 3), 2, (0, 0)),
    ]

    def make_params(k, C, OC, KH, KW):
        ks = jax.random.split(k, 6)
        weight = jax.random.normal(ks[1], (OC, C, KH, KW), jnp.float32) * 0.1
        gamma = jax.random.uniform(ks[2], (OC,), jnp.float32, 0.5, 1.5)
        beta = jax.random.normal(ks[3], (OC,), jnp.float32) * 0.1
        mean = jax.random.normal(ks[4], (OC,), jnp.float32) * 0.1
        var = jax.random.uniform(ks[5], (OC,), jnp.float32, 0.5, 1.5)
        return ks[0], weight, gamma, beta, mean, var

    for name, N, H, W, C, OC, (KH, KW), s, pad in configs:
        key, sub = jax.random.split(key)
        x_key, weight, gamma, beta, mean, var = make_params(sub, C, OC, KH, KW)
        x = jax.random.normal(x_key, (N, H, W, C), jnp.float32)

        out = basic_conv2d_nhwc(x, weight, gamma, beta, mean, var,
                                stride=s, padding=pad)
        out = jax.block_until_ready(out)

        ref = _reference_nhwc(x, weight, gamma, beta, mean, var,
                              stride=s, padding=pad)
        np.testing.assert_allclose(
            np.asarray(out.astype(jnp.float32)), np.asarray(ref),
            atol=1e-2, rtol=2e-2, err_msg=f"mismatch for config {name}")

    # Fused parallel 1x1 branches sharing one input (Block35/17/8-style).
    key, sub = jax.random.split(key)
    ks = jax.random.split(sub, 3)
    x = jax.random.normal(ks[0], (2, 8, 8, 32), jnp.float32)
    branches = []
    for i, oc in enumerate((16, 24)):
        _, w, g, b, m, v = make_params(ks[i + 1], 32, oc, 1, 1)
        branches.append((w, g, b, m, v))
    outs = fused_branch_conv1x1_nhwc(x, branches)
    outs = jax.block_until_ready(outs)
    for i, (w, g, b, m, v) in enumerate(branches):
        ref = _reference_nhwc(x, w, g, b, m, v, stride=1, padding=0)
        np.testing.assert_allclose(
            np.asarray(outs[i].astype(jnp.float32)), np.asarray(ref),
            atol=1e-2, rtol=2e-2, err_msg=f"mismatch for fused branch {i}")

    print("KERNEL_OK")
</pallas_src>

<mosaic_0001>
module attributes {stable_mosaic.version = 11 : i64} {
  func.func @_probe(%arg0: i32, %arg1: memref<8x128xf32, #tpu.memory_space<vmem>>, %arg2: memref<8x128xf32, #tpu.memory_space<vmem>>) attributes {dimension_semantics = [#tpu.dimension_semantics<arbitrary>], iteration_bounds = array<i64: 1>, scalar_prefetch = 0 : i64, scratch_operands = 0 : i64, tpu.core_type = #tpu.core_type<tc>, window_params = [{pipeline_mode = #tpu.pipeline_mode<synchronous>, transform_indices = @transform_0, window_bounds = array<i64: 8, 128>}, {pipeline_mode = #tpu.pipeline_mode<synchronous>, transform_indices = @transform_1, window_bounds = array<i64: 8, 128>}]} {
    %c0 = arith.constant 0 : index
    %c0_0 = arith.constant 0 : index
    %0 = vector.load %arg1[%c0, %c0_0] : memref<8x128xf32, #tpu.memory_space<vmem>>, vector<8x128xf32>
    %cst = arith.constant 1.000000e+00 : f32
    %1 = vector.broadcast %cst : f32 to vector<8x128xf32>
    %2 = arith.addf %0, %1 : vector<8x128xf32>
    %c0_1 = arith.constant 0 : index
    %c0_2 = arith.constant 0 : index
    %3 = vector.load %arg2[%c0_1, %c0_2] : memref<8x128xf32, #tpu.memory_space<vmem>>, vector<8x128xf32>
    tpu.vector_store %arg2[%c0_1, %c0_2], %2 {strides = array<i32>} : memref<8x128xf32, #tpu.memory_space<vmem>>, vector<8x128xf32>,
    return
  }
  func.func @transform_0(%arg0: i32) -> (i32, i32) {
    %c0_i32 = arith.constant 0 : i32
    %c0_i32_0 = arith.constant 0 : i32
    %c0_i32_1 = arith.constant 0 : i32
    return %c0_i32, %c0_i32_0 : i32, i32
  }
  func.func @transform_1(%arg0: i32) -> (i32, i32) {
    %c0_i32 = arith.constant 0 : i32
    %c0_i32_0 = arith.constant 0 : i32
    %c0_i32_1 = arith.constant 0 : i32
    return %c0_i32, %c0_i32_0 : i32, i32
  }
}

module attributes {stable_mosaic.version = 11 : i64} {
  func.func @_gemm_scale_bias_relu_kernel(%arg0: i32, %arg1: i32, %arg2: memref<128x32xbf16, #tpu.memory_space<vmem>>, %arg3: memref<32x128xbf16, #tpu.memory_space<vmem>>, %arg4: memref<1x128xf32, #tpu.memory_space<vmem>>, %arg5: memref<1x128xf32, #tpu.memory_space<vmem>>, %arg6: memref<128x128xbf16, #tpu.memory_space<vmem>>) attributes {dimension_semantics = [#tpu.dimension_semantics<parallel>, #tpu.dimension_semantics<parallel>], iteration_bounds = array<i64: 1, 1>, scalar_prefetch = 0 : i64, scratch_operands = 0 : i64, tpu.core_type = #tpu.core_type<tc>, window_params = [{transform_indices = @transform_0, window_bounds = array<i64: 128, 32>}, {transform_indices = @transform_1, window_bounds = array<i64: 32, 128>}, {transform_indices = @transform_2, window_bounds = array<i64: 1, 128>}, {transform_indices = @transform_3, window_bounds = array<i64: 1, 128>}, {transform_indices = @transform_4, window_bounds = array<i64: 128, 128>}]} {
    %c0 = arith.constant 0 : index
    %c0_0 = arith.constant 0 : index
    %0 = vector.load %arg2[%c0, %c0_0] : memref<128x32xbf16, #tpu.memory_space<vmem>>, vector<128x32xbf16>
    %c0_1 = arith.constant 0 : index
    %c0_2 = arith.constant 0 : index
    %1 = vector.load %arg3[%c0_1, %c0_2] : memref<32x128xbf16, #tpu.memory_space<vmem>>, vector<32x128xbf16>
    %cst = arith.constant dense<0.000000e+00> : vector<128x128xf32>
    %2 = tpu.matmul %0, %1, %cst {dimension_numbers = #tpu.dot_dimension_numbers<[1], [0], [0], [1], [0, 0, 1, 1], [], []>} : vector<128x32xbf16>, vector<32x128xbf16>, vector<128x128xf32> -> vector<128x128xf32>
    %c0_3 = arith.constant 0 : index
    %c0_4 = arith.constant 0 : index
    %3 = vector.load %arg4[%c0_3, %c0_4] : memref<1x128xf32, #tpu.memory_space<vmem>>, vector<1x128xf32>
    %4 = vector.broadcast %3 : vector<1x128xf32> to vector<128x128xf32>
    %5 = arith.mulf %2, %4 : vector<128x128xf32>
    %c0_5 = arith.constant 0 : index
    %c0_6 = arith.constant 0 : index
    %6 = vector.load %arg5[%c0_5, %c0_6] : memref<1x128xf32, #tpu.memory_space<vmem>>, vector<1x128xf32>
    %7 = vector.broadcast %6 : vector<1x128xf32> to vector<128x128xf32>
    %8 = arith.addf %5, %7 : vector<128x128xf32>
    %cst_7 = arith.constant 0.000000e+00 : f32
    %9 = vector.broadcast %cst_7 : f32 to vector<128x128xf32>
    %10 = arith.maximumf %8, %9 : vector<128x128xf32>
    %11 = arith.truncf %10 : vector<128x128xf32> to vector<128x128xbf16>
    %c0_8 = arith.constant 0 : index
    %c0_9 = arith.constant 0 : index
    %12 = vector.load %arg6[%c0_8, %c0_9] : memref<128x128xbf16, #tpu.memory_space<vmem>>, vector<128x128xbf16>
    tpu.vector_store %arg6[%c0_8, %c0_9], %11 {strides = array<i32>} : memref<128x128xbf16, #tpu.memory_space<vmem>>, vector<128x128xbf16>,
    return
  }
  func.func @transform_0(%arg0: i32, %arg1: i32) -> (i32, i32) {
    %c0_i32 = arith.constant 0 : i32
    %c0_i32_0 = arith.constant 0 : i32
    return %arg0, %c0_i32 : i32, i32
  }
  func.func @transform_1(%arg0: i32, %arg1: i32) -> (i32, i32) {
    %c0_i32 = arith.constant 0 : i32
    %c0_i32_0 = arith.constant 0 : i32
    return %c0_i32, %arg1 : i32, i32
  }
  func.func @transform_2(%arg0: i32, %arg1: i32) -> (i32, i32) {
    %c0_i32 = arith.constant 0 : i32
    %c0_i32_0 = arith.constant 0 : i32
    return %c0_i32, %arg1 : i32, i32
  }
  func.func @transform_3(%arg0: i32, %arg1: i32) -> (i32, i32) {
    %c0_i32 = arith.constant 0 : i32
    %c0_i32_0 = arith.constant 0 : i32
    return %c0_i32, %arg1 : i32, i32
  }
  func.func @transform_4(%arg0: i32, %arg1: i32) -> (i32, i32) {
    %c0_i32 = arith.constant 0 : i32
    return %arg0, %arg1 : i32, i32
  }
}

</mosaic_0001>

<bundles_post_ra>
// kernel: tpu_custom_call.1
= control target key start
LH: loop header
LB: loop body
LE: loop exit
PB: predicated region body
PF: predicated region fallthrough
CT: control target
= control target key end

     0   :  { %6 = vsyncpa [#allocation3], 0  ;;  %s125_s0 = inlined_call_operand.hbm [shape: f32[8,128], index: 0, kind: input, shape index: {}]   ;;  %s126_s1 = inlined_call_operand.hbm [shape: f32[8,128], index: 1, kind: output, shape index: {}]  }
   0x1   :  { %7 = vsyncpa [#allocation4], 0  ;;  %s89_s6 = smov [#allocation2]   ;;  %s41_s10 = scalar_lea.hbm %s125_s0, 128 }
   0x2   :  { %s14_s7 = sshll.u32 %s89_s6, 4  ;;  %p42_p0 = scmp.ne.s32.totalorder %s125_s0, %s41_s10  ;;  %s15_s7 = int_to_ptr.vmem [resolvable:$true] %s14_s7 }
   0x3   :  { %p45_p1 = scmp.lt.u32.totalorder %s41_s10, %s125_s0 }
   0x5   :  { %p47_p2 = pnand %p45_p1, %p42_p0 }
   0x7   :  { %50 = shalt.err (!%p47_p2)
}
   0x8   :  { %s51_s15 = scalar_lea.vmem %s15_s7, 128  ;;  %p56_p4 = scmp.lt.s32.totalorder %s15_s7, %s15_s7 }
   0x9   :  { %p52_p3 = scmp.ne.s32.totalorder %s15_s7, %s51_s15  ;;  %p57_p5 = scmp.lt.s32.totalorder %s51_s15, %s51_s15 }
   0xb   :  { %p58_p6 = por %p57_p5, %p56_p4 }
   0xd   :  { %p59_p7 = pnand %p58_p6, %p52_p3 }
   0xf   :  { %62 = shalt.err (!%p59_p7)
}
  0x10   :  { %17 = dma.hbm_to_vmem [thread:$0]  %s125_s0, 128, %s15_s7, [#allocation3]  }
  0x11   :  { %85 = dma.done.wait [#allocation3], 128  }
  0x12   :  { %86 = vsyncadd [#allocation3], 4294967168  ;;  %s90_s18 = smov [#allocation5]   ;;  %v21_v0 = vld [vmem:[#allocation2] sm:$0xff] }
  0x13   :  { %s30_s19 = sshll.u32 %s90_s18, 4  ;;  %v22_v1 = vadd.f32 1.0, %v21_v0  ;;  %s31_s19 = int_to_ptr.vmem [resolvable:$true] %s30_s19 }
  0x14   :  { %s63_s20 = scalar_lea.vmem %s31_s19, 128  ;;  %p68_p9 = scmp.lt.s32.totalorder %s31_s19, %s31_s19 }
  0x15   :  { %23 = vst [vmem:[#allocation5] sm:$0xff] %v22_v1  ;;  %p64_p8 = scmp.ne.s32.totalorder %s31_s19, %s63_s20  ;;  %p69_p10 = scmp.lt.s32.totalorder %s63_s20, %s63_s20 }
  0x17   :  { %p70_p11 = por %p69_p10, %p68_p9 }
  0x19   :  { %p71_p12 = pnand %p70_p11, %p64_p8 }
  0x1b   :  { %74 = shalt.err (!%p71_p12)
}
  0x1c   :  { %s75_s23 = scalar_lea.hbm %s126_s1, 128 }
  0x1d   :  { %p76_p13 = scmp.ne.s32.totalorder %s126_s1, %s75_s23  ;;  %p79_p0 = scmp.lt.u32.totalorder %s75_s23, %s126_s1 }
  0x1f   :  { %p81_p1 = pnand %p79_p0, %p76_p13 }
  0x21   :  { %84 = shalt.err (!%p81_p1)
}
  0x22   :  { %33 = dma.vmem_to_hbm [thread:$0]  %s31_s19, 128, %s126_s1, [#allocation4]  }
  0x23   :  { %87 = dma.done.wait [#allocation4], 128  }
  0x24   :  { %88 = vsyncadd [#allocation4], 4294967168 }
  0x25   :  { %37 = vsyncpa [#allocation3], 1 }
  0x26   :  { %38 = vsyncpa [#allocation4], 1 }

// kernel: tpu_custom_call.1
= control target key start
LH: loop header
LB: loop body
LE: loop exit
PB: predicated region body
PF: predicated region fallthrough
CT: control target
= control target key end

     0   :  { %vm91_vm0 = vcmask 261120   ;;  %s643_s0 = inlined_call_operand.vmem [shape: bf16[128,32], index: 0, kind: input, shape index: {}]   ;;  %s644_s1 = inlined_call_operand.vmem [shape: bf16[32,128], index: 1, kind: input, shape index: {}]   ;;  %s645_s2 = inlined_call_operand.vmem [shape: f32[1,128], index: 2, kind: input, shape index: {}]   ;;  %s646_s3 = inlined_call_operand.vmem [shape: f32[1,128], index: 3, kind: input, shape index: {}]   ;;  %s647_s4 = inlined_call_operand.hbm [shape: bf16[128,128], index: 4, kind: output, shape index: {}]  }
   0x1   :  { %v507_v0 = vld [vmem:[%s644_s1] sm:$0xff]   ;;  %v508_v1 = vld [vmem:[%s644_s1 + $0x8] sm:$0xff]   ;;  %v513_v6 = vld [vmem:[%s643_s0 + $0x10] sm:$0xff]  }
   0x2   :  { %480 = vmatprep.subr.bf16.mxu0 %v507_v0  ;;  %500 = vmatprep.subr.bf16.mxu1 %v507_v0  ;;  %v509_v2 = vld [vmem:[%s643_s0] sm:$0xff]   ;;  %v511_v4 = vld [vmem:[%s643_s0 + $0x8] sm:$0xff]   ;;  %v514_v7 = vld [vmem:[%s643_s0 + $0x30] sm:$0xff]  }
   0x3   :  { %481 = vmatpush3.bf16.msra.mxu0 %v507_v0  ;;  %502 = vmatpush3.bf16.msra.mxu1 %v507_v0  ;;  %v510_v3 = vld [vmem:[%s643_s0 + $0x20] sm:$0xff]   ;;  %v512_v5 = vld [vmem:[%s643_s0 + $0x28] sm:$0xff]  }
   0x4   :  { %482 = vmatprep.subr.bf16.mxu0 %v508_v1  ;;  %501 = vmatprep.subr.bf16.mxu1 %v508_v1 }
   0x5   :  { %484 = vmatprep.mubr.msk.bf16.mxu0 %vm91_vm0, %v509_v2  ;;  %492 = vmatprep.mubr.msk.bf16.mxu1 %vm91_vm0, %v510_v3 }
   0x7   :  { %483 = vmatpush3.bf16.msra.mxu0 %v508_v1  ;;  %503 = vmatpush3.bf16.msra.mxu1 %v508_v1 }
   0xa   :  { %485 = vmatmul.mubr.msk.bf16.vlgmr.msra.gmra.mrb[0].mxu0 %vm91_vm0, %v511_v4  ;;  %493 = vmatmul.mubr.msk.bf16.vlgmr.msra.gmra.mrb[0].mxu1 %vm91_vm0, %v512_v5 }
   0xb   :  { %9 = vsyncpa [#allocation3], 0  ;;  %488 = vmatprep.mubr.msk.bf16.mxu0 %vm91_vm0, %v513_v6  ;;  %496 = vmatprep.mubr.msk.bf16.mxu1 %vm91_vm0, %v514_v7  ;;  %v515_v8 = vld [vmem:[%s643_s0 + $0x18] sm:$0xff]   ;;  %v389_v10 = vld [vmem:[%s645_s2] ss:$0 sm:$0xff] }
   0xc   :  { %v516_v9 = vld [vmem:[%s643_s0 + $0x38] sm:$0xff]   ;;  %v613_v12 = vld [vmem:[%s646_s3] ss:$0 sm:$0xff]  ;;  %s541_s0 = smov [#allocation2]  }
   0xd   :  { %s360_s2 = sshll.u32 %s541_s0, 4  ;;  %s361_s2 = int_to_ptr.vmem [resolvable:$true] %s360_s2 }
   0xe   :  { %s517_s3 = scalar_lea.vmem %s361_s2, 1024  ;;  %p522_p1 = scmp.lt.s32.totalorder %s361_s2, %s361_s2 }
   0xf   :  { %p518_p0 = scmp.ne.s32.totalorder %s361_s2, %s517_s3  ;;  %p523_p2 = scmp.lt.s32.totalorder %s517_s3, %s517_s3 }
  0x11   :  { %p524_p3 = por %p523_p2, %p522_p1 }
  0x12   :  { %489 = vmatmul.mubr.msk.bf16.gmra.mrb[4].mxu0 %vm91_vm0, %v515_v8  ;;  %497 = vmatmul.mubr.msk.bf16.gmra.mrb[4].mxu1 %vm91_vm0, %v516_v9 }
  0x13   :  { %p525_p4 = pnand %p524_p3, %p518_p0 }
  0xdd   :  { %v486_v11 = vpop.f32.mrb[0].mxu0  ;;  %v494_v13 = vpop.f32.mrb[0].mxu1 }
  0xde   :  { %v222_v14 = vmul.f32 %v486_v11, %v389_v10  ;;  %v230_v15 = vmul.f32 %v494_v13, %v389_v10  ;;  %v150_v16 = vpop.f32.mrb[1].mxu0  ;;  %v182_v17 = vpop.f32.mrb[1].mxu1 }
  0xdf   :  { %v220_v18 = vmul.f32 %v389_v10, %v150_v16  ;;  %v228_v19 = vmul.f32 %v389_v10, %v182_v17  ;;  %v487_v20 = vpop.f32.mrb[2].mxu0  ;;  %v495_v21 = vpop.f32.mrb[2].mxu1 }
  0xe0   :  { %v245_v22 = vadd.f32 %v613_v12, %v222_v14  ;;  %v253_v23 = vadd.f32 %v613_v12, %v230_v15  ;;  %v223_v24 = vmul.f32 %v487_v20, %v389_v10  ;;  %v231_v25 = vmul.f32 %v495_v21, %v389_v10  ;;  %v153_v26 = vpop.f32.mrb[3].mxu0  ;;  %v185_v27 = vpop.f32.mrb[3].mxu1 }
  0xe1   :  { %v243_v28 = vadd.f32 %v613_v12, %v220_v18  ;;  %v251_v29 = vadd.f32 %v613_v12, %v228_v19  ;;  %v221_v30 = vmul.f32 %v389_v10, %v153_v26  ;;  %v229_v31 = vmul.f32 %v389_v10, %v185_v27 }
  0xe2   :  { %v246_v32 = vadd.f32 %v613_v12, %v223_v24  ;;  %v254_v33 = vadd.f32 %v613_v12, %v231_v25  ;;  %v261_v36 = vmax.f32 %v245_v22, 0.0  ;;  %v269_v37 = vmax.f32 %v253_v23, 0.0 }
  0xe3   :  { %v244_v34 = vadd.f32 %v613_v12, %v221_v30  ;;  %v252_v35 = vadd.f32 %v613_v12, %v229_v31  ;;  %v259_v40 = vmax.f32 %v243_v28, 0.0  ;;  %v267_v41 = vmax.f32 %v251_v29, 0.0 }
  0xe4   :  { %v262_v38 = vmax.f32 %v246_v32, 0.0  ;;  %v270_v39 = vmax.f32 %v254_v33, 0.0 }
  0xe5   :  { %v260_v42 = vmax.f32 %v244_v34, 0.0  ;;  %v268_v43 = vmax.f32 %v252_v35, 0.0  ;;  %v490_v44 = vpop.f32.mrb[4].mxu0  ;;  %v498_v45 = vpop.f32.mrb[4].mxu1 }
  0xe6   :  { %v431_v46 = vpack.c.bf16 %v262_v38, %v261_v36  ;;  %v451_v47 = vpack.c.bf16 %v270_v39, %v269_v37  ;;  %v226_v48 = vmul.f32 %v490_v44, %v389_v10  ;;  %v234_v49 = vmul.f32 %v498_v45, %v389_v10  ;;  %v166_v50 = vpop.f32.mrb[5].mxu0  ;;  %v198_v51 = vpop.f32.mrb[5].mxu1 }
  0xe7   :  { %v426_v52 = vpack.c.bf16 %v260_v42, %v259_v40  ;;  %v446_v53 = vpack.c.bf16 %v268_v43, %v267_v41  ;;  %v224_v54 = vmul.f32 %v389_v10, %v166_v50  ;;  %v232_v55 = vmul.f32 %v389_v10, %v198_v51  ;;  %v491_v56 = vpop.f32.mrb[6].mxu0  ;;  %v499_v57 = vpop.f32.mrb[6].mxu1 }
  0xe8   :  { %463 = vst [vmem:[#allocation2 + $0x8] sm:$0xff] %v431_v46   ;;  %467 = vst [vmem:[#allocation2 + $0x28] sm:$0xff] %v451_v47   ;;  %v249_v58 = vadd.f32 %v613_v12, %v226_v48  ;;  %v257_v59 = vadd.f32 %v613_v12, %v234_v49  ;;  %v227_v60 = vmul.f32 %v491_v56, %v389_v10  ;;  %v169_v62 = vpop.f32.mrb[7].mxu0  ;;  %v201_v63 = vpop.f32.mrb[7].mxu1 }
  0xe9   :  { %v235_v61 = vmul.f32 %v499_v57, %v389_v10  ;;  %427 = vst [vmem:[#allocation2] sm:$0xff] %v426_v52   ;;  %466 = vst [vmem:[#allocation2 + $0x20] sm:$0xff] %v446_v53   ;;  %v247_v0 = vadd.f32 %v613_v12, %v224_v54  ;;  %v255_v1 = vadd.f32 %v613_v12, %v232_v55 }
  0xea   :  { %v225_v2 = vmul.f32 %v389_v10, %v169_v62  ;;  %v233_v3 = vmul.f32 %v389_v10, %v201_v63  ;;  %v250_v4 = vadd.f32 %v613_v12, %v227_v60  ;;  %v265_v8 = vmax.f32 %v249_v58, 0.0 }
  0xeb   :  { %v258_v5 = vadd.f32 %v613_v12, %v235_v61  ;;  %v273_v9 = vmax.f32 %v257_v59, 0.0  ;;  %v263_v14 = vmax.f32 %v247_v0, 0.0  ;;  %v271_v15 = vmax.f32 %v255_v1, 0.0 }
  0xec   :  { %v248_v6 = vadd.f32 %v613_v12, %v225_v2  ;;  %v256_v7 = vadd.f32 %v613_v12, %v233_v3  ;;  %v266_v11 = vmax.f32 %v250_v4, 0.0 }
  0xed   :  { %v274_v13 = vmax.f32 %v258_v5, 0.0 }
  0xee   :  { %v264_v16 = vmax.f32 %v248_v6, 0.0  ;;  %v272_v17 = vmax.f32 %v256_v7, 0.0  ;;  %v441_v18 = vpack.c.bf16 %v266_v11, %v265_v8 }
  0xef   :  { %v461_v10 = vpack.c.bf16 %v274_v13, %v273_v9 }
  0xf0   :  { %v436_v19 = vpack.c.bf16 %v264_v16, %v263_v14  ;;  %v456_v20 = vpack.c.bf16 %v272_v17, %v271_v15  ;;  %465 = vst [vmem:[#allocation2 + $0x18] sm:$0xff] %v441_v18  }
  0xf1   :  { %469 = vst [vmem:[#allocation2 + $0x38] sm:$0xff] %v461_v10  }
  0xf2   :  { %464 = vst [vmem:[#allocation2 + $0x10] sm:$0xff] %v436_v19   ;;  %468 = vst [vmem:[#allocation2 + $0x30] sm:$0xff] %v456_v20  }
  0xf3   :  { %528 = shalt.err (!%p525_p4)
}
  0xf4   :  { %s529_s14 = scalar_lea.hbm %s647_s4, 1024 }
  0xf5   :  { %p530_p5 = scmp.ne.s32.totalorder %s647_s4, %s529_s14  ;;  %p533_p6 = scmp.lt.u32.totalorder %s529_s14, %s647_s4 }
  0xf7   :  { %p535_p7 = pnand %p533_p6, %p530_p5 }
  0xf9   :  { %538 = shalt.err (!%p535_p7)
}
  0xfa   :  { %s542_s19 = smov 64   ;;  %s543_s20 = smov 4  }
  0xfb   :  { %366 = dma.vmem_to_hbm [thread:$0]  %s361_s2, 1024, %s647_s4, [#allocation3], %s542_s19, %s542_s19, %s543_s20  }
  0xfc   :  { %539 = dma.done.wait [#allocation3], 1024  }
  0xfd   :  { %540 = vsyncadd [#allocation3], 4294966272 }
  0xfe   :  { %370 = vsyncpa [#allocation3], 1 }

</bundles_post_ra>
